<compile_context>
chip_gen: v5e
topology: v5e:2x2
jax: 0.10.0
libtpu: 0.0.40
codegen_flags: <defaults>
</compile_context>

<pallas_src>
import math

import jax
import jax.numpy as jnp
from jax import lax
from jax.experimental import pallas as pl
from jax.experimental.pallas import tpu as pltpu


def _make_dice_kernel(rb, tm, NC, nk_total, rem_cols, has_invalid):
    """Per-tile accumulation kernel. All sizes are static Python ints."""
    full_chunks = tm // 128           # tm is always a multiple of 128
    last_full = rem_cols // 128       # full 128-chunks in the globally-last tile
    last_tail = rem_cols % 128        # valid lanes in the partial chunk (if any)
    uniform = (rem_cols == tm)        # every tile is completely full

    def kernel(x_ref, t_ref, inter_ref, denom_ref):
        c = pl.program_id(1)          # column megacore split
        k = pl.program_id(2)          # reduction step within this core

        @pl.when(k == 0)
        def _():
            inter_ref[...] = jnp.zeros_like(inter_ref)
            denom_ref[...] = jnp.zeros_like(denom_ref)

        def accumulate(n_full, tail_lanes):
            acc_i = inter_ref[...]
            acc_s = denom_ref[...]

            def chunk(ai, as_, xj, tj):
                return ai + xj * tj, as_ + (xj + tj)

            if 0 < n_full <= 8:
                # Short loops: fully unrolled static slices.
                for j in range(n_full):
                    xj = x_ref[:, j * 128:(j + 1) * 128].astype(jnp.float32)
                    tj = t_ref[:, j * 128:(j + 1) * 128].astype(jnp.float32)
                    acc_i, acc_s = chunk(acc_i, acc_s, xj, tj)
            elif n_full > 8:
                # Long loops: bounded code size, carries stay in vregs.
                def body(j, carry):
                    ai, as_ = carry
                    off = pl.multiple_of(j * 128, 128)
                    xj = x_ref[:, pl.ds(off, 128)].astype(jnp.float32)
                    tj = t_ref[:, pl.ds(off, 128)].astype(jnp.float32)
                    return chunk(ai, as_, xj, tj)

                acc_i, acc_s = lax.fori_loop(0, n_full, body,
                                             (acc_i, acc_s), unroll=8)

            if tail_lanes > 0:
                # Single masked chunk (only ever on the globally-last tile).
                off = n_full * 128
                xj = x_ref[:, off:off + 128].astype(jnp.float32)
                tj = t_ref[:, off:off + 128].astype(jnp.float32)
                keep = lax.broadcasted_iota(jnp.int32, (rb, 128), 1) < tail_lanes
                xj = jnp.where(keep, xj, 0.0)
                tj = jnp.where(keep, tj, 0.0)
                acc_i, acc_s = chunk(acc_i, acc_s, xj, tj)

            inter_ref[...] = acc_i
            denom_ref[...] = acc_s

        if uniform and not has_invalid:
            # Fast path: every tile full, every block valid — no branches.
            accumulate(full_chunks, 0)
        elif nk_total == 1:
            # Single (possibly ragged) tile, always valid.
            accumulate(last_full, last_tail)
        else:
            g = k * NC + c            # global column-block index (matches in_map)
            if uniform:
                @pl.when(g < nk_total)
                def _():
                    accumulate(full_chunks, 0)
            else:
                if has_invalid:
                    not_last = jnp.logical_and(g < nk_total, g != nk_total - 1)
                else:
                    not_last = g < nk_total - 1

                @pl.when(not_last)
                def _():
                    accumulate(full_chunks, 0)

                @pl.when(g == nk_total - 1)
                def _():
                    accumulate(last_full, last_tail)

    return kernel


def binary_dice_loss(inputs, targets, *, smooth=1.0):
    """inputs, targets: any shape with leading batch dim N (e.g. N,C,H,W)."""
    N = inputs.shape[0]
    x = inputs.reshape(N, -1)         # native dtype — no wrapper-side cast
    t = targets.reshape(N, -1)
    M = x.shape[1]
    assert t.shape[1] == M, "input/target element counts must match"

    isx = jnp.dtype(x.dtype).itemsize
    ist = jnp.dtype(t.dtype).itemsize

    # --- Dtype-aware sublane row packing (pure contiguous reshape).
    S = max(8, 32 // min(isx, ist))   # f32: 8 sublanes, bf16: 16, int8: 32
    R = S // math.gcd(N, S)
    if M % R != 0:
        R = 1
    rows = N * R
    Mr = M // R
    x = x.reshape(rows, Mr)
    t = t.reshape(rows, Mr)

    # --- Row blocking keeps the two (rb,128) f32 accumulators in vregs.
    if rows <= 128:
        rb, NR = rows, 1
    else:
        rb = 64                        # multiple of 8/16/32 → always legal
        NR = pl.cdiv(rows, rb)

    # --- Tile width: sized from the chip's VMEM capacity (no hard cap).
    try:
        vmem_cap = int(pltpu.get_tpu_info().vmem_capacity_bytes)
    except Exception:
        vmem_cap = 64 * 1024 * 1024
    if vmem_cap < 32 * 1024 * 1024:
        vmem_cap = 64 * 1024 * 1024
    vmem_limit = max(32 * 1024 * 1024, int(vmem_cap * 0.70))
    tile_budget = vmem_limit - 4 * 1024 * 1024

    Mr_pad = ((Mr + 127) // 128) * 128
    per_col = 2 * rb * (isx + ist)     # 2 pipeline buffers per input
    tm = (tile_budget // per_col // 128) * 128
    tm = int(max(128, min(tm, Mr_pad)))

    nk_total = pl.cdiv(Mr, tm)
    rem_cols = Mr - (nk_total - 1) * tm

    # --- 2-way megacore split of the column axis (interleaved → always
    # balanced, never disabled by an odd block count). Skipped when the
    # row-block axis already provides a parallel axis or work is tiny.
    NC = 2 if (NR == 1 and nk_total >= 4) else 1
    nk_per_core = pl.cdiv(nk_total, NC)
    has_invalid = NC * nk_per_core > nk_total

    kernel = _make_dice_kernel(rb, tm, NC, nk_total, rem_cols, has_invalid)

    if has_invalid:
        def in_map(r, c, k):
            # Clamp the (single) out-of-range block to a valid one; the kernel
            # skips its accumulation via the g < nk_total guard.
            return (r, jnp.minimum(k * NC + c, nk_total - 1))
    else:
        def in_map(r, c, k):
            return (r, k * NC + c)

    def out_map(r, c, k):
        return (r, c, 0, 0)

    partial_shape = jax.ShapeDtypeStruct((NR, NC, rb, 128), jnp.float32)

    inter_p, denom_p = pl.pallas_call(
        kernel,
        out_shape=(partial_shape, partial_shape),
        grid_spec=pltpu.PrefetchScalarGridSpec(
            num_scalar_prefetch=0,
            grid=(NR, NC, nk_per_core),
            in_specs=[
                pl.BlockSpec((rb, tm), in_map),
                pl.BlockSpec((rb, tm), in_map),
            ],
            out_specs=(
                pl.BlockSpec((None, None, rb, 128), out_map),
                pl.BlockSpec((None, None, rb, 128), out_map),
            ),
        ),
        compiler_params=pltpu.CompilerParams(
            dimension_semantics=("parallel", "parallel", "arbitrary"),
            vmem_limit_bytes=int(vmem_limit),
        ),
    )(x, t)

    # --- Tiny finalize (a few KB) in plain JAX: lane/core sums, drop the
    # (possibly garbage) padding rows of a partial row block, fold the packed
    # row groups back per sample, dice, mean.
    inter_rows = inter_p.sum(axis=(1, 3)).reshape(NR * rb)[:rows]
    denom_rows = denom_p.sum(axis=(1, 3)).reshape(NR * rb)[:rows]
    inter = inter_rows.reshape(N, R).sum(axis=1)
    denom = denom_rows.reshape(N, R).sum(axis=1)
    dice = (2.0 * inter + smooth) / (denom + smooth)
    return 1.0 - jnp.sum(dice) / N


def _reference(inputs, targets):
    N = inputs.shape[0]
    smooth = 1.0
    xf = inputs.reshape(N, -1).astype(jnp.float32)
    tf = targets.reshape(N, -1).astype(jnp.float32)
    inter = (xf * tf).sum(axis=1)
    dice = (2.0 * inter + smooth) / (xf.sum(axis=1) + tf.sum(axis=1) + smooth)
    return 1.0 - dice.sum() / N


if __name__ == "__main__":
    key = jax.random.PRNGKey(0)
    k1, k2 = jax.random.split(key)

    # Small shapes consistent with the module: N=2, C=4, H=W=16.
    inputs = jax.nn.sigmoid(jax.random.normal(k1, (2, 4, 16, 16), jnp.float32))
    targets = (jax.random.uniform(k2, (2, 4, 16, 16)) > 0.5).astype(jnp.float32)
    loss = jax.block_until_ready(jax.jit(binary_dice_loss)(inputs, targets))
    ref = _reference(inputs, targets)
    assert jnp.allclose(loss, ref, atol=1e-5, rtol=1e-5), (loss, ref)

    # Ragged / non-lane-aligned shape: exercises the in-kernel tail mask
    # (replaces the old jnp.pad fallback).
    k3, k4 = jax.random.split(k2)
    xi2 = jax.nn.sigmoid(jax.random.normal(k3, (3, 5, 7, 9), jnp.float32))
    tg2 = (jax.random.uniform(k4, (3, 5, 7, 9)) > 0.5).astype(jnp.float32)
    loss2 = jax.block_until_ready(jax.jit(binary_dice_loss)(xi2, tg2))
    ref2 = _reference(xi2, tg2)
    assert jnp.allclose(loss2, ref2, atol=1e-5, rtol=1e-5), (loss2, ref2)

    # Wider flattened dim: exercises the fori_loop chunk path.
    k5, k6 = jax.random.split(k4)
    xi3 = jax.nn.sigmoid(jax.random.normal(k5, (2, 8, 64, 64), jnp.float32))
    tg3 = (jax.random.uniform(k6, (2, 8, 64, 64)) > 0.5).astype(jnp.float32)
    loss3 = jax.block_until_ready(jax.jit(binary_dice_loss)(xi3, tg3))
    ref3 = _reference(xi3, tg3)
    assert jnp.allclose(loss3, ref3, atol=1e-5, rtol=1e-5), (loss3, ref3)

    print("KERNEL_OK")
</pallas_src>

<mosaic_0001>
module attributes {stable_mosaic.version = 11 : i64} {
  func.func @kernel(%arg0: i32, %arg1: i32, %arg2: i32, %arg3: memref<8x256xf32, #tpu.memory_space<vmem>>, %arg4: memref<8x256xf32, #tpu.memory_space<vmem>>, %arg5: memref<1x1x8x128xf32, #tpu.memory_space<vmem>>, %arg6: memref<1x1x8x128xf32, #tpu.memory_space<vmem>>) attributes {dimension_semantics = [#tpu.dimension_semantics<parallel>, #tpu.dimension_semantics<parallel>, #tpu.dimension_semantics<arbitrary>], iteration_bounds = array<i64: 1, 1, 1>, scalar_prefetch = 0 : i64, scratch_operands = 0 : i64, tpu.core_type = #tpu.core_type<tc>, window_params = [{transform_indices = @transform_0, window_bounds = array<i64: 8, 256>}, {transform_indices = @transform_1, window_bounds = array<i64: 8, 256>}, {transform_indices = @transform_2, window_bounds = array<i64: 1, 1, 8, 128>}, {transform_indices = @transform_3, window_bounds = array<i64: 1, 1, 8, 128>}]} {
    %c0_i32 = arith.constant 0 : i32
    %0 = arith.cmpi eq, %arg2, %c0_i32 : i32
    %1 = arith.extui %0 : i1 to i32
    %c0_i32_0 = arith.constant 0 : i32
    %2 = arith.cmpi ne, %1, %c0_i32_0 : i32
    scf.if %2 {
      %cst = arith.constant 0.000000e+00 : f32
      %25 = vector.broadcast %cst : f32 to vector<8x128xf32>
      %c0_23 = arith.constant 0 : index
      %c0_24 = arith.constant 0 : index
      %c0_25 = arith.constant 0 : index
      %c0_26 = arith.constant 0 : index
      %26 = vector.load %arg5[%c0_23, %c0_24, %c0_25, %c0_26] : memref<1x1x8x128xf32, #tpu.memory_space<vmem>>, vector<1x1x8x128xf32>
      %27 = vector.shape_cast %26 : vector<1x1x8x128xf32> to vector<8x128xf32>
      %28 = vector.shape_cast %25 : vector<8x128xf32> to vector<1x1x8x128xf32>
      tpu.vector_store %arg5[%c0_23, %c0_24, %c0_25, %c0_26], %28 {strides = array<i32>} : memref<1x1x8x128xf32, #tpu.memory_space<vmem>>, vector<1x1x8x128xf32>,
      %cst_27 = arith.constant 0.000000e+00 : f32
      %29 = vector.broadcast %cst_27 : f32 to vector<8x128xf32>
      %c0_28 = arith.constant 0 : index
      %c0_29 = arith.constant 0 : index
      %c0_30 = arith.constant 0 : index
      %c0_31 = arith.constant 0 : index
      %30 = vector.load %arg6[%c0_28, %c0_29, %c0_30, %c0_31] : memref<1x1x8x128xf32, #tpu.memory_space<vmem>>, vector<1x1x8x128xf32>
      %31 = vector.shape_cast %30 : vector<1x1x8x128xf32> to vector<8x128xf32>
      %32 = vector.shape_cast %29 : vector<8x128xf32> to vector<1x1x8x128xf32>
      tpu.vector_store %arg6[%c0_28, %c0_29, %c0_30, %c0_31], %32 {strides = array<i32>} : memref<1x1x8x128xf32, #tpu.memory_space<vmem>>, vector<1x1x8x128xf32>,
    } else {
    }
    %c0 = arith.constant 0 : index
    %c0_1 = arith.constant 0 : index
    %c0_2 = arith.constant 0 : index
    %c0_3 = arith.constant 0 : index
    %3 = vector.load %arg5[%c0, %c0_1, %c0_2, %c0_3] : memref<1x1x8x128xf32, #tpu.memory_space<vmem>>, vector<1x1x8x128xf32>
    %4 = vector.shape_cast %3 : vector<1x1x8x128xf32> to vector<8x128xf32>
    %c0_4 = arith.constant 0 : index
    %c0_5 = arith.constant 0 : index
    %c0_6 = arith.constant 0 : index
    %c0_7 = arith.constant 0 : index
    %5 = vector.load %arg6[%c0_4, %c0_5, %c0_6, %c0_7] : memref<1x1x8x128xf32, #tpu.memory_space<vmem>>, vector<1x1x8x128xf32>
    %6 = vector.shape_cast %5 : vector<1x1x8x128xf32> to vector<8x128xf32>
    %c0_8 = arith.constant 0 : index
    %c0_9 = arith.constant 0 : index
    %7 = vector.load %arg3[%c0_8, %c0_9] : memref<8x256xf32, #tpu.memory_space<vmem>>, vector<8x128xf32>
    %c0_10 = arith.constant 0 : index
    %c0_11 = arith.constant 0 : index
    %8 = vector.load %arg4[%c0_10, %c0_11] : memref<8x256xf32, #tpu.memory_space<vmem>>, vector<8x128xf32>
    %9 = arith.mulf %7, %8 : vector<8x128xf32>
    %10 = arith.addf %4, %9 : vector<8x128xf32>
    %11 = arith.addf %7, %8 : vector<8x128xf32>
    %12 = arith.addf %6, %11 : vector<8x128xf32>
    %c0_12 = arith.constant 0 : index
    %c128 = arith.constant 128 : index
    %13 = vector.load %arg3[%c0_12, %c128] : memref<8x256xf32, #tpu.memory_space<vmem>>, vector<8x128xf32>
    %c0_13 = arith.constant 0 : index
    %c128_14 = arith.constant 128 : index
    %14 = vector.load %arg4[%c0_13, %c128_14] : memref<8x256xf32, #tpu.memory_space<vmem>>, vector<8x128xf32>
    %15 = arith.mulf %13, %14 : vector<8x128xf32>
    %16 = arith.addf %10, %15 : vector<8x128xf32>
    %17 = arith.addf %13, %14 : vector<8x128xf32>
    %18 = arith.addf %12, %17 : vector<8x128xf32>
    %c0_15 = arith.constant 0 : index
    %c0_16 = arith.constant 0 : index
    %c0_17 = arith.constant 0 : index
    %c0_18 = arith.constant 0 : index
    %19 = vector.load %arg5[%c0_15, %c0_16, %c0_17, %c0_18] : memref<1x1x8x128xf32, #tpu.memory_space<vmem>>, vector<1x1x8x128xf32>
    %20 = vector.shape_cast %19 : vector<1x1x8x128xf32> to vector<8x128xf32>
    %21 = vector.shape_cast %16 : vector<8x128xf32> to vector<1x1x8x128xf32>
    tpu.vector_store %arg5[%c0_15, %c0_16, %c0_17, %c0_18], %21 {strides = array<i32>} : memref<1x1x8x128xf32, #tpu.memory_space<vmem>>, vector<1x1x8x128xf32>,
    %c0_19 = arith.constant 0 : index
    %c0_20 = arith.constant 0 : index
    %c0_21 = arith.constant 0 : index
    %c0_22 = arith.constant 0 : index
    %22 = vector.load %arg6[%c0_19, %c0_20, %c0_21, %c0_22] : memref<1x1x8x128xf32, #tpu.memory_space<vmem>>, vector<1x1x8x128xf32>
    %23 = vector.shape_cast %22 : vector<1x1x8x128xf32> to vector<8x128xf32>
    %24 = vector.shape_cast %18 : vector<8x128xf32> to vector<1x1x8x128xf32>
    tpu.vector_store %arg6[%c0_19, %c0_20, %c0_21, %c0_22], %24 {strides = array<i32>} : memref<1x1x8x128xf32, #tpu.memory_space<vmem>>, vector<1x1x8x128xf32>,
    return
  }
  func.func @transform_0(%arg0: i32, %arg1: i32, %arg2: i32) -> (i32, i32) {
    %c1_i32 = arith.constant 1 : i32
    %0 = arith.muli %arg2, %c1_i32 : i32
    %1 = arith.addi %0, %arg1 : i32
    %c0_i32 = arith.constant 0 : i32
    return %arg0, %1 : i32, i32
  }
  func.func @transform_1(%arg0: i32, %arg1: i32, %arg2: i32) -> (i32, i32) {
    %c1_i32 = arith.constant 1 : i32
    %0 = arith.muli %arg2, %c1_i32 : i32
    %1 = arith.addi %0, %arg1 : i32
    %c0_i32 = arith.constant 0 : i32
    return %arg0, %1 : i32, i32
  }
  func.func @transform_2(%arg0: i32, %arg1: i32, %arg2: i32) -> (i32, i32, i32, i32) {
    %c0_i32 = arith.constant 0 : i32
    %c0_i32_0 = arith.constant 0 : i32
    %c0_i32_1 = arith.constant 0 : i32
    return %arg0, %arg1, %c0_i32, %c0_i32_0 : i32, i32, i32, i32
  }
  func.func @transform_3(%arg0: i32, %arg1: i32, %arg2: i32) -> (i32, i32, i32, i32) {
    %c0_i32 = arith.constant 0 : i32
    %c0_i32_0 = arith.constant 0 : i32
    %c0_i32_1 = arith.constant 0 : i32
    return %arg0, %arg1, %c0_i32, %c0_i32_0 : i32, i32, i32, i32
  }
}

</mosaic_0001>

<bundles_post_ra>
// kernel: binary_dice_loss.1
= control target key start
LH: loop header
LB: loop body
LE: loop exit
PB: predicated region body
PF: predicated region fallthrough
CT: control target
= control target key end

     0   :  { %s138_s0 = inlined_call_operand.vmem [shape: f32[8,256], index: 0, kind: input, shape index: {}]   ;;  %s139_s1 = inlined_call_operand.vmem [shape: f32[8,256], index: 1, kind: input, shape index: {}]   ;;  %s140_s2 = inlined_call_operand.vmem [shape: f32[1,1,8,128], index: 2, kind: output, shape index: {0}]   ;;  %s141_s3 = inlined_call_operand.vmem [shape: f32[1,1,8,128], index: 3, kind: output, shape index: {1}]  }
   0x1   :  { %v65_v0 = vld [vmem:[%s138_s0] sm:$0xff]  ;;  %v71_v2 = vld [vmem:[%s138_s0 + $0x8] sm:$0xff] }
   0x2   :  { %v66_v1 = vld [vmem:[%s139_s1] sm:$0xff]  ;;  %v72_v4 = vld [vmem:[%s139_s1 + $0x8] sm:$0xff] }
   0x3   :  { %v67_v3 = vmul.f32 %v66_v1, %v65_v0  ;;  %v69_v5 = vadd.f32 %v66_v1, %v65_v0  ;;  %v73_v6 = vmul.f32 %v72_v4, %v71_v2  ;;  %v75_v7 = vadd.f32 %v72_v4, %v71_v2 }
   0x5   :  { %v74_v8 = vadd.f32 %v73_v6, %v67_v3  ;;  %v76_v9 = vadd.f32 %v75_v7, %v69_v5 }
   0x7   :  { %77 = vst [vmem:[%s140_s2] sm:$0xff] %v74_v8 }
   0x8   :  { %78 = vst [vmem:[%s141_s3] sm:$0xff] %v76_v9 }

</bundles_post_ra>
